<compile_context>
chip_gen: v7x
topology: tpu7x:2x2x1
jax: 0.10.0
libtpu: 0.0.40
codegen_flags: <defaults>
</compile_context>

<pallas_src>
import functools

import jax
import jax.numpy as jnp
import numpy as np
from jax.experimental import pallas as pl
from jax.experimental.pallas import tpu as pltpu


# ----------------------------- Pallas kernel -----------------------------

def _conv_bn_lrelu_kernel(x_ref, w_ref, shift_ref, o_ref, *, k, cin, wp):
    # x_ref:     (1, Cin, Lp)       flattened zero-padded image (channel-major), compute dtype
    # w_ref:     (Cout, k*k*Cin)    BN-scale-folded weight, (kh,kw)-major / ci-minor columns
    # shift_ref: (Cout, 1)          f32:  beta - running_mean * scale
    # o_ref:     (1, Cout, Ho*Wp)   lane-dense output block (garbage cols trimmed in wrapper)
    cout = o_ref.shape[1]
    n_lanes = o_ref.shape[2]                      # Ho * Wp

    wv = w_ref[...]                               # (Cout, k*k*Cin), loaded once
    acc = jnp.zeros((cout, n_lanes), jnp.float32)

    # k*k = 9 accumulating matmuls; each RHS is a contiguous lane slice of the flat image.
    for kh in range(k):
        for kw in range(k):
            idx = kh * k + kw
            off = kh * wp + kw
            acc = acc + jnp.dot(
                wv[:, idx * cin:(idx + 1) * cin],             # (Cout, Cin)
                x_ref[0, :, off:off + n_lanes],               # (Cin, Ho*Wp)
                preferred_element_type=jnp.float32)

    y = acc + shift_ref[...]                      # folded BatchNorm shift (f32 epilogue)
    y = jnp.where(y >= 0, y, 0.1 * y)             # LeakyReLU(0.1)
    o_ref[0] = y.astype(o_ref.dtype)              # single full-width store


# ----------------------------- wrapper -----------------------------

@functools.partial(jax.jit, static_argnames=("kernel_size", "stride", "compute_dtype"))
def conv_bn_lrelu_forward(x_nchw, weight, gamma, beta, running_mean, running_var,
                          *, kernel_size, stride, eps=1e-5, compute_dtype=jnp.float32):
    """Equivalent of Conv.forward (eval mode).  x_nchw: [N, Cin, H, W] -> [N, Cout, Ho, Wo]."""
    N, Cin, H, W = x_nchw.shape
    Cout = weight.shape[0]
    k = kernel_size
    pad = (k - 1) // 2 if k else 0

    # Dense (stride-1) geometry computed by the kernel; stride>1 subsamples afterwards.
    Hp, Wp = H + 2 * pad, W + 2 * pad
    Ho1, Wo1 = Hp - k + 1, Wp - k + 1

    # Zero-pad the halo (+1 extra bottom row so every (kh,kw) lane-window slice of the
    # flattened image stays in bounds), then flatten (Hp, Wp) -> lanes (layout-free reshape).
    xp = jnp.pad(x_nchw, ((0, 0), (0, 0), (pad, pad + 1), (pad, pad)))
    Lp = (Hp + 1) * Wp
    x_flat = xp.reshape(N, Cin, Lp).astype(compute_dtype)

    # Fold BN scale into the conv weight in f32, then cast to the matmul compute dtype.
    scale = gamma * jax.lax.rsqrt(running_var + eps)                  # (Cout,)
    w_scaled = weight * scale[:, None, None, None]                    # (Cout, Cin, k, k)
    w_flat = (jnp.transpose(w_scaled, (0, 2, 3, 1))                   # (Cout, k, k, Cin)
              .reshape(Cout, k * k * Cin).astype(compute_dtype))
    shift = (beta - running_mean * scale).reshape(Cout, 1).astype(jnp.float32)

    n_lanes = Ho1 * Wp                                                # kernel output width

    # Per-step VMEM footprint (pipeline double-buffers every operand) + accumulator headroom.
    isz = np.dtype(compute_dtype).itemsize
    blk_bytes = (Cin * Lp * isz + Cout * k * k * Cin * isz
                 + Cout * 4 + Cout * n_lanes * 4)
    vmem_limit = int(min(100 * 1024 * 1024,
                         max(8 * 1024 * 1024, 2 * blk_bytes + (2 << 20))))

    kernel = functools.partial(_conv_bn_lrelu_kernel, k=k, cin=Cin, wp=Wp)

    out_flat = pl.pallas_call(
        kernel,
        out_shape=jax.ShapeDtypeStruct((N, Cout, n_lanes), jnp.float32),
        grid_spec=pltpu.PrefetchScalarGridSpec(
            num_scalar_prefetch=0,
            grid=(N,),
            in_specs=[
                pl.BlockSpec((1, Cin, Lp), lambda n: (n, 0, 0)),
                pl.BlockSpec((Cout, k * k * Cin), lambda n: (0, 0)),
                pl.BlockSpec((Cout, 1), lambda n: (0, 0)),
            ],
            out_specs=pl.BlockSpec((1, Cout, n_lanes), lambda n: (n, 0, 0)),
        ),
        compiler_params=pltpu.CompilerParams(
            dimension_semantics=("parallel",),
            vmem_limit_bytes=vmem_limit),
    )(x_flat, w_flat, shift)

    # (N, Cout, Ho1*Wp) -> (N, Cout, Ho1, Wp) is layout-free; drop the k-1 garbage columns
    # per output row that the flat formulation produces, then apply the stride by subsampling.
    out = out_flat.reshape(N, Cout, Ho1, Wp)[:, :, :, :Wo1]
    if stride > 1:
        out = out[:, :, ::stride, ::stride]
    return out


# ----------------------------- reference (pure JAX) -----------------------------

def _reference(x_nchw, weight, gamma, beta, running_mean, running_var,
               kernel_size, stride, eps=1e-5):
    pad = (kernel_size - 1) // 2 if kernel_size else 0
    y = jax.lax.conv_general_dilated(
        x_nchw, weight, window_strides=(stride, stride),
        padding=((pad, pad), (pad, pad)),
        dimension_numbers=("NCHW", "OIHW", "NCHW"))
    scale = (gamma / jnp.sqrt(running_var + eps)).reshape(1, -1, 1, 1)
    shift = (beta - running_mean * gamma / jnp.sqrt(running_var + eps)).reshape(1, -1, 1, 1)
    y = y * scale + shift
    return jnp.where(y >= 0, y, 0.1 * y)


# ----------------------------- main -----------------------------

if __name__ == "__main__":
    # inplanes = (Cin, Cout, kernel_size, stride)
    inplanes = (4, 8, 3, 1)
    Cin, Cout, k, stride = inplanes
    N, H, W = 2, 16, 16

    key = jax.random.PRNGKey(0)
    kx, kw_, kg, kb, km, kv = jax.random.split(key, 6)

    x = jax.random.normal(kx, (N, Cin, H, W), dtype=jnp.float32)
    weight = jax.random.normal(kw_, (Cout, Cin, k, k), dtype=jnp.float32) * 0.1
    gamma = jax.random.uniform(kg, (Cout,), dtype=jnp.float32, minval=0.5, maxval=1.5)
    beta = jax.random.normal(kb, (Cout,), dtype=jnp.float32) * 0.1
    running_mean = jax.random.normal(km, (Cout,), dtype=jnp.float32) * 0.1
    running_var = jax.random.uniform(kv, (Cout,), dtype=jnp.float32, minval=0.5, maxval=1.5)

    ref = _reference(x, weight, gamma, beta, running_mean, running_var, k, stride)

    # f32 matmul path: tight check against the XLA reference.
    out = conv_bn_lrelu_forward(x, weight, gamma, beta, running_mean, running_var,
                                kernel_size=k, stride=stride)
    out = jax.block_until_ready(out)
    np.testing.assert_allclose(np.asarray(out), np.asarray(ref), rtol=1e-4, atol=1e-4)

    # bf16 matmul-input path (f32 accumulation + f32 epilogue): loose sanity check.
    out_bf16 = conv_bn_lrelu_forward(x, weight, gamma, beta, running_mean, running_var,
                                     kernel_size=k, stride=stride,
                                     compute_dtype=jnp.bfloat16)
    out_bf16 = jax.block_until_ready(out_bf16)
    np.testing.assert_allclose(np.asarray(out_bf16), np.asarray(ref), rtol=1e-1, atol=1e-1)

    print("KERNEL_OK")
</pallas_src>

<mosaic_0001>
module attributes {stable_mosaic.version = 11 : i64} {
  func.func @_conv_bn_lrelu_kernel(%arg0: i32, %arg1: memref<1x4x342xf32, #tpu.memory_space<vmem>>, %arg2: memref<8x36xf32, #tpu.memory_space<vmem>>, %arg3: memref<8x1xf32, #tpu.memory_space<vmem>>, %arg4: memref<1x8x288xf32, #tpu.memory_space<vmem>>) attributes {dimension_semantics = [#tpu.dimension_semantics<parallel>], iteration_bounds = array<i64: 2>, scalar_prefetch = 0 : i64, scratch_operands = 0 : i64, tpu.core_type = #tpu.core_type<tc>, window_params = [{transform_indices = @transform_0, window_bounds = array<i64: 1, 4, 342>}, {pipeline_mode = #tpu.pipeline_mode<synchronous>, transform_indices = @transform_1, window_bounds = array<i64: 8, 36>}, {pipeline_mode = #tpu.pipeline_mode<synchronous>, transform_indices = @transform_2, window_bounds = array<i64: 8, 1>}, {transform_indices = @transform_3, window_bounds = array<i64: 1, 8, 288>}]} {
    %c0 = arith.constant 0 : index
    %c0_0 = arith.constant 0 : index
    %0 = vector.load %arg2[%c0, %c0_0] : memref<8x36xf32, #tpu.memory_space<vmem>>, vector<8x36xf32>
    %cst = arith.constant 0.000000e+00 : f32
    %1 = vector.broadcast %cst : f32 to vector<8x288xf32>
    %2 = vector.extract_strided_slice %0 {offsets = [0, 0], sizes = [8, 4], strides = [1, 1]} : vector<8x36xf32> to vector<8x4xf32>
    %c0_1 = arith.constant 0 : index
    %c0_2 = arith.constant 0 : index
    %c0_3 = arith.constant 0 : index
    %3 = vector.load %arg1[%c0_1, %c0_2, %c0_3] : memref<1x4x342xf32, #tpu.memory_space<vmem>>, vector<1x4x288xf32>
    %4 = vector.shape_cast %3 : vector<1x4x288xf32> to vector<4x288xf32>
    %cst_4 = arith.constant dense<0.000000e+00> : vector<8x288xf32>
    %5 = tpu.matmul %2, %4, %cst_4 {dimension_numbers = #tpu.dot_dimension_numbers<[1], [0], [0], [1], [0, 0, 1, 1], [], []>} : vector<8x4xf32>, vector<4x288xf32>, vector<8x288xf32> -> vector<8x288xf32>
    %6 = arith.addf %1, %5 : vector<8x288xf32>
    %7 = vector.extract_strided_slice %0 {offsets = [0, 4], sizes = [8, 4], strides = [1, 1]} : vector<8x36xf32> to vector<8x4xf32>
    %c0_5 = arith.constant 0 : index
    %c0_6 = arith.constant 0 : index
    %c1 = arith.constant 1 : index
    %8 = vector.load %arg1[%c0_5, %c0_6, %c1] : memref<1x4x342xf32, #tpu.memory_space<vmem>>, vector<1x4x288xf32>
    %9 = vector.shape_cast %8 : vector<1x4x288xf32> to vector<4x288xf32>
    %cst_7 = arith.constant dense<0.000000e+00> : vector<8x288xf32>
    %10 = tpu.matmul %7, %9, %cst_7 {dimension_numbers = #tpu.dot_dimension_numbers<[1], [0], [0], [1], [0, 0, 1, 1], [], []>} : vector<8x4xf32>, vector<4x288xf32>, vector<8x288xf32> -> vector<8x288xf32>
    %11 = arith.addf %6, %10 : vector<8x288xf32>
    %12 = vector.extract_strided_slice %0 {offsets = [0, 8], sizes = [8, 4], strides = [1, 1]} : vector<8x36xf32> to vector<8x4xf32>
    %c0_8 = arith.constant 0 : index
    %c0_9 = arith.constant 0 : index
    %c2 = arith.constant 2 : index
    %13 = vector.load %arg1[%c0_8, %c0_9, %c2] : memref<1x4x342xf32, #tpu.memory_space<vmem>>, vector<1x4x288xf32>
    %14 = vector.shape_cast %13 : vector<1x4x288xf32> to vector<4x288xf32>
    %cst_10 = arith.constant dense<0.000000e+00> : vector<8x288xf32>
    %15 = tpu.matmul %12, %14, %cst_10 {dimension_numbers = #tpu.dot_dimension_numbers<[1], [0], [0], [1], [0, 0, 1, 1], [], []>} : vector<8x4xf32>, vector<4x288xf32>, vector<8x288xf32> -> vector<8x288xf32>
    %16 = arith.addf %11, %15 : vector<8x288xf32>
    %17 = vector.extract_strided_slice %0 {offsets = [0, 12], sizes = [8, 4], strides = [1, 1]} : vector<8x36xf32> to vector<8x4xf32>
    %c0_11 = arith.constant 0 : index
    %c0_12 = arith.constant 0 : index
    %c18 = arith.constant 18 : index
    %18 = vector.load %arg1[%c0_11, %c0_12, %c18] : memref<1x4x342xf32, #tpu.memory_space<vmem>>, vector<1x4x288xf32>
    %19 = vector.shape_cast %18 : vector<1x4x288xf32> to vector<4x288xf32>
    %cst_13 = arith.constant dense<0.000000e+00> : vector<8x288xf32>
    %20 = tpu.matmul %17, %19, %cst_13 {dimension_numbers = #tpu.dot_dimension_numbers<[1], [0], [0], [1], [0, 0, 1, 1], [], []>} : vector<8x4xf32>, vector<4x288xf32>, vector<8x288xf32> -> vector<8x288xf32>
    %21 = arith.addf %16, %20 : vector<8x288xf32>
    %22 = vector.extract_strided_slice %0 {offsets = [0, 16], sizes = [8, 4], strides = [1, 1]} : vector<8x36xf32> to vector<8x4xf32>
    %c0_14 = arith.constant 0 : index
    %c0_15 = arith.constant 0 : index
    %c19 = arith.constant 19 : index
    %23 = vector.load %arg1[%c0_14, %c0_15, %c19] : memref<1x4x342xf32, #tpu.memory_space<vmem>>, vector<1x4x288xf32>
    %24 = vector.shape_cast %23 : vector<1x4x288xf32> to vector<4x288xf32>
    %cst_16 = arith.constant dense<0.000000e+00> : vector<8x288xf32>
    %25 = tpu.matmul %22, %24, %cst_16 {dimension_numbers = #tpu.dot_dimension_numbers<[1], [0], [0], [1], [0, 0, 1, 1], [], []>} : vector<8x4xf32>, vector<4x288xf32>, vector<8x288xf32> -> vector<8x288xf32>
    %26 = arith.addf %21, %25 : vector<8x288xf32>
    %27 = vector.extract_strided_slice %0 {offsets = [0, 20], sizes = [8, 4], strides = [1, 1]} : vector<8x36xf32> to vector<8x4xf32>
    %c0_17 = arith.constant 0 : index
    %c0_18 = arith.constant 0 : index
    %c20 = arith.constant 20 : index
    %28 = vector.load %arg1[%c0_17, %c0_18, %c20] : memref<1x4x342xf32, #tpu.memory_space<vmem>>, vector<1x4x288xf32>
    %29 = vector.shape_cast %28 : vector<1x4x288xf32> to vector<4x288xf32>
    %cst_19 = arith.constant dense<0.000000e+00> : vector<8x288xf32>
    %30 = tpu.matmul %27, %29, %cst_19 {dimension_numbers = #tpu.dot_dimension_numbers<[1], [0], [0], [1], [0, 0, 1, 1], [], []>} : vector<8x4xf32>, vector<4x288xf32>, vector<8x288xf32> -> vector<8x288xf32>
    %31 = arith.addf %26, %30 : vector<8x288xf32>
    %32 = vector.extract_strided_slice %0 {offsets = [0, 24], sizes = [8, 4], strides = [1, 1]} : vector<8x36xf32> to vector<8x4xf32>
    %c0_20 = arith.constant 0 : index
    %c0_21 = arith.constant 0 : index
    %c36 = arith.constant 36 : index
    %33 = vector.load %arg1[%c0_20, %c0_21, %c36] : memref<1x4x342xf32, #tpu.memory_space<vmem>>, vector<1x4x288xf32>
    %34 = vector.shape_cast %33 : vector<1x4x288xf32> to vector<4x288xf32>
    %cst_22 = arith.constant dense<0.000000e+00> : vector<8x288xf32>
    %35 = tpu.matmul %32, %34, %cst_22 {dimension_numbers = #tpu.dot_dimension_numbers<[1], [0], [0], [1], [0, 0, 1, 1], [], []>} : vector<8x4xf32>, vector<4x288xf32>, vector<8x288xf32> -> vector<8x288xf32>
    %36 = arith.addf %31, %35 : vector<8x288xf32>
    %37 = vector.extract_strided_slice %0 {offsets = [0, 28], sizes = [8, 4], strides = [1, 1]} : vector<8x36xf32> to vector<8x4xf32>
    %c0_23 = arith.constant 0 : index
    %c0_24 = arith.constant 0 : index
    %c37 = arith.constant 37 : index
    %38 = vector.load %arg1[%c0_23, %c0_24, %c37] : memref<1x4x342xf32, #tpu.memory_space<vmem>>, vector<1x4x288xf32>
    %39 = vector.shape_cast %38 : vector<1x4x288xf32> to vector<4x288xf32>
    %cst_25 = arith.constant dense<0.000000e+00> : vector<8x288xf32>
    %40 = tpu.matmul %37, %39, %cst_25 {dimension_numbers = #tpu.dot_dimension_numbers<[1], [0], [0], [1], [0, 0, 1, 1], [], []>} : vector<8x4xf32>, vector<4x288xf32>, vector<8x288xf32> -> vector<8x288xf32>
    %41 = arith.addf %36, %40 : vector<8x288xf32>
    %42 = vector.extract_strided_slice %0 {offsets = [0, 32], sizes = [8, 4], strides = [1, 1]} : vector<8x36xf32> to vector<8x4xf32>
    %c0_26 = arith.constant 0 : index
    %c0_27 = arith.constant 0 : index
    %c38 = arith.constant 38 : index
    %43 = vector.load %arg1[%c0_26, %c0_27, %c38] : memref<1x4x342xf32, #tpu.memory_space<vmem>>, vector<1x4x288xf32>
    %44 = vector.shape_cast %43 : vector<1x4x288xf32> to vector<4x288xf32>
    %cst_28 = arith.constant dense<0.000000e+00> : vector<8x288xf32>
    %45 = tpu.matmul %42, %44, %cst_28 {dimension_numbers = #tpu.dot_dimension_numbers<[1], [0], [0], [1], [0, 0, 1, 1], [], []>} : vector<8x4xf32>, vector<4x288xf32>, vector<8x288xf32> -> vector<8x288xf32>
    %46 = arith.addf %41, %45 : vector<8x288xf32>
    %c0_29 = arith.constant 0 : index
    %c0_30 = arith.constant 0 : index
    %47 = vector.load %arg3[%c0_29, %c0_30] : memref<8x1xf32, #tpu.memory_space<vmem>>, vector<8x1xf32>
    %48 = vector.broadcast %47 : vector<8x1xf32> to vector<8x288xf32>
    %49 = arith.addf %46, %48 : vector<8x288xf32>
    %cst_31 = arith.constant 0.000000e+00 : f32
    %50 = vector.broadcast %cst_31 : f32 to vector<8x288xf32>
    %51 = arith.cmpf oge, %49, %50 : vector<8x288xf32>
    %cst_32 = arith.constant 1.000000e-01 : f32
    %52 = vector.broadcast %cst_32 : f32 to vector<8x288xf32>
    %53 = arith.mulf %52, %49 : vector<8x288xf32>
    %54 = arith.select %51, %49, %53 : vector<8x288xi1>, vector<8x288xf32>
    %c0_33 = arith.constant 0 : index
    %c0_34 = arith.constant 0 : index
    %c0_35 = arith.constant 0 : index
    %55 = vector.load %arg4[%c0_33, %c0_34, %c0_35] : memref<1x8x288xf32, #tpu.memory_space<vmem>>, vector<1x8x288xf32>
    %56 = vector.shape_cast %55 : vector<1x8x288xf32> to vector<8x288xf32>
    %57 = vector.shape_cast %54 : vector<8x288xf32> to vector<1x8x288xf32>
    tpu.vector_store %arg4[%c0_33, %c0_34, %c0_35], %57 {strides = array<i32>} : memref<1x8x288xf32, #tpu.memory_space<vmem>>, vector<1x8x288xf32>,
    return
  }
  func.func @transform_0(%arg0: i32) -> (i32, i32, i32) {
    %c0_i32 = arith.constant 0 : i32
    %c0_i32_0 = arith.constant 0 : i32
    %c0_i32_1 = arith.constant 0 : i32
    return %arg0, %c0_i32, %c0_i32_0 : i32, i32, i32
  }
  func.func @transform_1(%arg0: i32) -> (i32, i32) {
    %c0_i32 = arith.constant 0 : i32
    %c0_i32_0 = arith.constant 0 : i32
    %c0_i32_1 = arith.constant 0 : i32
    return %c0_i32, %c0_i32_0 : i32, i32
  }
  func.func @transform_2(%arg0: i32) -> (i32, i32) {
    %c0_i32 = arith.constant 0 : i32
    %c0_i32_0 = arith.constant 0 : i32
    %c0_i32_1 = arith.constant 0 : i32
    return %c0_i32, %c0_i32_0 : i32, i32
  }
  func.func @transform_3(%arg0: i32) -> (i32, i32, i32) {
    %c0_i32 = arith.constant 0 : i32
    %c0_i32_0 = arith.constant 0 : i32
    %c0_i32_1 = arith.constant 0 : i32
    return %arg0, %c0_i32, %c0_i32_0 : i32, i32, i32
  }
}

</mosaic_0001>

<bundles_post_ra>
// kernel: conv_bn_lrelu_forward.1
= control target key start
LH: loop header
LB: loop body
LE: loop exit
PB: predicated region body
PF: predicated region fallthrough
CT: control target
= control target key end

     0   :  { %s1951_s12 = smov 0   ;;  %s2112_s0 = inlined_call_operand.vmem [shape: f32[2,4,342], index: 0, kind: input, shape index: {}]   ;;  %s2113_s1 = inlined_call_operand.vmem [shape: f32[8,36], index: 1, kind: input, shape index: {}]   ;;  %s2114_s2 = inlined_call_operand.vmem [shape: f32[8,1], index: 2, kind: input, shape index: {}]   ;;  %s2115_s3 = inlined_call_operand.vmem [shape: f32[2,8,288], index: 3, kind: output, shape index: {}]  }
   0x1 LB: > { %s1742_s13 = sadd.s32 4294967295, %s1911_s12   ;;  %p1746_p0 = scmp.ge.s32.totalorder %s1911_s12, 1  ;;  %s1911_s12 = sphi %s1951_s12, %s13_s12  }
   0x2   : > { %p137_p1 = scmp.lt.s32.totalorder %s1911_s12, 3 }
   0x4   : > { %p138_p2 = pnand %p1746_p0, %p137_p1 }
   0x5   : > { %p161_p3 = scmp.lt.s32.totalorder (!%p138_p2), %s1742_s13, 1  ;;  %v1913_v0 = vmov (!%p138_p2), 0.0   ;;  %vm1914_vm0 = vmmov (!%p138_p2), 0   ;;  %s1915_s18 = smov (!%p138_p2), 127   ;;  %v1982_v3 = vld [vmem:[%s2113_s1] sm:$0xff] (!%p138_p2)  ;;  %v1930_v12 = vmov (!%p138_p2), 0  }
   0x6   : > { %141 = sbr.rel (%p138_p2) target bundleno = 425 (0x1a9), region = 32  ;;  %1814 = vmatprep.subr.mxu1 (!%p138_p2), %v1913_v0  ;;  %1816 = vmatprep.mubr.msk.f32.mxu1 (!%p138_p2), %vm1914_vm0, %v1913_v0  ;;  %s1916_s21 = smov (!%p138_p2), 124   ;;  %v1665_v13 = vld [vmem:[%s2114_s2] sm:$0xff] (!%p138_p2)  ;;  %vm192_vm1 = vcmask (!%p138_p2), 1043456   ;;  %vm186_vm2 = vcmask (!%p138_p2), 1039360   ;;  %vm189_vm3 = vcmask (!%p138_p2), 31744  }
   0x7   : > { %263 = vmatprep.mubr.f32.mxu0 (!%p138_p2), %v1913_v0  ;;  %s1917_s22 = smov (!%p138_p2), 126   ;;  %s1918_s23 = smov (!%p138_p2), 120   ;;  %1903 = vset.pattern.permute.xlu0 (!%p138_p2), %v1930_v12  ;;  %vm502_vm4 = vcmask (!%p138_p2), 1031168   ;;  %vm670_vm5 = vcmask (!%p138_p2), 900096   ;;  %vm838_vm6 = vcmask (!%p138_p2), 891904   ;;  %vm1006_vm7 = vcmask (!%p138_p2), 883712  }
   0x8   : > { %s1919_s24 = smov (!%p138_p2), 110   ;;  %s1920_s25 = smov (!%p138_p2), 116   ;;  %vm1174_vm8 = vcmask (!%p138_p2), 752640   ;;  %vm1342_vm9 = vcmask (!%p138_p2), 744448   ;;  %vm1510_vm10 = vcmask (!%p138_p2), 736256   ;;  %vm1685_vm12 = vcmask (!%p138_p2), 261120  }
   0x9   : > { %s1921_s26 = smov (!%p138_p2), 109   ;;  %s1922_s27 = smov (!%p138_p2), 112  }
   0xa   : > { %s1923_s28 = smov (!%p138_p2), 108   ;;  %s1924_s29 = smov (!%p138_p2), 92  }
   0xb   : > { %s1925_s30 = smov (!%p138_p2), 104   ;;  %s1926_s4 = smov (!%p138_p2), 91  }
   0xc   : > { %s1927_s5 = smov (!%p138_p2), 100   ;;  %s1928_s6 = smov (!%p138_p2), 90  }
   0xd   : > { %s2117_s13 = smov (!%p161_p3, %s1742_s13), 1  ;;  %s1929_s7 = smov 96  }
   0xe   : > { %s1875_s14 = smul.u32 12, %s2117_s13 }
   0xf   : > { %s1876_s10 = smul.u32 24, %s2117_s13 }
  0x10   : > { %s1969_s17 = scalar_lea.vmem %s2112_s0, %s1875_s14 }
  0x11   : > { %v1972_v1 = vld [vmem:[%s1969_s17] sm:$0xff]  ;;  %v1986_v4 = vld [vmem:[%s1969_s17 + $0x8] sm:$0xf]  ;;  %s170_s15 = scalar_lea.vmem %s2115_s3, %s1876_s10 }
  0x12   : > { %180 = vrot.lane.b32.xlu1 %v1972_v1, %s1915_s18  ;;  %v1977_v2 = vcombine.high %v1972_v1, %v1972_v1  ;;  %v490_v5 = vld [vmem:[%s1969_s17 + $0x8] sm:$0xf] }
  0x13   : > { %v658_v6 = vld [vmem:[%s1969_s17 + $0x8] sm:$0xf] }
  0x14   : > { %182 = vrot.lane.b32.xlu0 %v1977_v2, %s1915_s18  ;;  %v826_v7 = vld [vmem:[%s1969_s17 + $0x8] sm:$0xf] }
  0x15   : > { %v994_v8 = vld [vmem:[%s1969_s17 + $0x8] sm:$0xf] }
  0x16   : > { %175 = vrot.lane.b32.xlu1 %v1982_v3, %s1916_s21  ;;  %v1162_v9 = vld [vmem:[%s1969_s17 + $0x8] sm:$0xf] }
  0x17   : > { %v1330_v10 = vld [vmem:[%s1969_s17 + $0x8] sm:$0xf] }
  0x18   : > { %184 = vrot.lane.b32.xlu0 %v1986_v4, %s1915_s18  ;;  %v1498_v11 = vld [vmem:[%s1969_s17 + $0x8] sm:$0xf] }
  0x1a   : > { %500 = vrot.lane.b32.xlu1 %v490_v5, %s1917_s22 }
  0x1c   : > { %498 = vrot.lane.b32.xlu0 %v1977_v2, %s1917_s22 }
  0x1e   : > { %491 = vrot.lane.b32.xlu1 %v1982_v3, %s1918_s23 }
  0x20   : > { %496 = vrot.lane.b32.xlu0 %v1972_v1, %s1917_s22 }
  0x22   : > { %668 = vrot.lane.b32.xlu1 %v658_v6, %s1919_s24 }
  0x24   : > { %666 = vrot.lane.b32.xlu0 %v1977_v2, %s1919_s24 }
  0x26   : > { %659 = vrot.lane.b32.xlu1 %v1982_v3, %s1920_s25 }
  0x28   : > { %664 = vrot.lane.b32.xlu0 %v1972_v1, %s1919_s24 }
  0x2a   : > { %836 = vrot.lane.b32.xlu1 %v826_v7, %s1921_s26 }
  0x2c   : > { %834 = vrot.lane.b32.xlu0 %v1977_v2, %s1921_s26 }
  0x2e   : > { %827 = vrot.lane.b32.xlu1 %v1982_v3, %s1922_s27 }
  0x30   : > { %832 = vrot.lane.b32.xlu0 %v1972_v1, %s1921_s26 }
  0x32   : > { %1004 = vrot.lane.b32.xlu1 %v994_v8, %s1923_s28 }
  0x34   : > { %1002 = vrot.lane.b32.xlu0 %v1977_v2, %s1923_s28 }
  0x36   : > { %995 = vrot.lane.b32.xlu1 %v1982_v3, %s1923_s28 }
  0x38   : > { %1000 = vrot.lane.b32.xlu0 %v1972_v1, %s1923_s28 }
  0x3a   : > { %1172 = vrot.lane.b32.xlu1 %v1162_v9, %s1924_s29 }
  0x3c   : > { %1170 = vrot.lane.b32.xlu0 %v1977_v2, %s1924_s29 }
  0x3e   : > { %1163 = vrot.lane.b32.xlu1 %v1982_v3, %s1925_s30 }
  0x40   : > { %1168 = vrot.lane.b32.xlu0 %v1972_v1, %s1924_s29 }
  0x42   : > { %1340 = vrot.lane.b32.xlu1 %v1330_v10, %s1926_s4 }
  0x44   : > { %1338 = vrot.lane.b32.xlu0 %v1977_v2, %s1926_s4 }
  0x46   : > { %1331 = vrot.lane.b32.xlu1 %v1982_v3, %s1927_s5 }
  0x48   : > { %1336 = vrot.lane.b32.xlu0 %v1972_v1, %s1926_s4 }
  0x4a   : > { %1508 = vrot.lane.b32.xlu1 %v1498_v11, %s1928_s6 }
  0x4c   : > { %1506 = vrot.lane.b32.xlu0 %v1977_v2, %s1928_s6 }
  0x4e   : > { %1499 = vrot.lane.b32.xlu1 %v1982_v3, %s1929_s7 }
  0x50   : > { %1504 = vrot.lane.b32.xlu0 %v1972_v1, %s1928_s6 }
  0x54   : > { %1668 = vperm.xlu0 %1903, %v1665_v13  }
  0x84   : > { %v181_v14 = vpop.permute.xlu1 %180 }
  0x86   : > { %v183_v15 = vpop.permute.xlu0 %182 }
  0x87   : > { %v187_v20 = vsel %vm186_vm2, %v181_v14, %v183_v15 }
  0x88   : > { %v176_v16 = vpop.permute.xlu1 %175 }
  0x8a   : > { %v185_v17 = vpop.permute.xlu0 %184 }
  0x8b   : > { %1815 = vmatpush3.msk.msra.mxu1 %vm192_vm1, %v185_v17  ;;  %v188_v18 = vsel %vm186_vm2, %v183_v15, %v185_v17 }
  0x8c   : > { %v501_v19 = vpop.permute.xlu1 %500  ;;  %1749 = vmatprep.subr.msk.mxu0 %vm192_vm1, %v188_v18  ;;  %1817 = vmatmul.mubr.msk.f32.vlgmr.msra.gmra.mrb[0].mxu1 %vm189_vm3, %v176_v16 }
  0x8d   : > { %1750 = vmatpush1.msk.msra.mxu0 %vm192_vm1, %v187_v20  ;;  %1819 = vmatprep.subr.mxu1 %v1913_v0 }
  0x8e   : > { %1751 = vmatmul.mubr.msk.f32.vlgmr.msra.gmra.mrb[0].mxu0 %vm189_vm3, %v176_v16  ;;  %1754 = vmatprep.subr.msk.mxu0 %vm192_vm1, %v1977_v2  ;;  %v499_v21 = vpop.permute.xlu0 %498 }
  0x8f   : > { %v504_v22 = vsel %vm502_vm4, %v499_v21, %v501_v19  ;;  %1755 = vmatpush1.msk.msra.mxu0 %vm192_vm1, %v1972_v1  ;;  %1820 = vmatpush3.msk.msra.mxu1 %vm192_vm1, %v1986_v4 }
  0x90   : > { %1821 = vmatprep.mubr.msk.f32.mxu1 %vm1914_vm0, %v1913_v0  ;;  %v492_v23 = vpop.permute.xlu1 %491  ;;  %1824 = vmatprep.subr.mxu1 %v1913_v0 }
  0x91   : > { %1822 = vmatmul.mubr.msk.f32.vlgmr.msra.gmra.mrb[2].mxu1 %vm189_vm3, %v1982_v3  ;;  %1759 = vmatprep.subr.msk.mxu0 %vm192_vm1, %v504_v22 }
  0x92   : > { %v497_v24 = vpop.permute.xlu0 %496  ;;  %1825 = vmatpush3.msk.msra.mxu1 %vm192_vm1, %v501_v19  ;;  %1826 = vmatprep.mubr.msk.f32.mxu1 %vm1914_vm0, %v1913_v0 }
  0x93   : > { %412 = vmatprep.mubr.f32.mxu0 %v1913_v0  ;;  %1829 = vmatprep.subr.mxu1 %v1913_v0  ;;  %v503_v25 = vsel %vm502_vm4, %v497_v24, %v499_v21 }
  0x94   : > { %v669_v26 = vpop.permute.xlu1 %668 }
  0x95   : > { %1827 = vmatmul.mubr.msk.f32.vlgmr.msra.gmra.mrb[4].mxu1 %vm189_vm3, %v492_v23 }
  0x96   : > { %1756 = vmatmul.mubr.msk.f32.vlgmr.msra.gmra.mrb[0].mxu0 %vm189_vm3, %v1982_v3  ;;  %v667_v27 = vpop.permute.xlu0 %666  ;;  %1830 = vmatpush3.msk.msra.mxu1 %vm192_vm1, %v669_v26 }
  0x97   : > { %1760 = vmatpush1.msk.msra.mxu0 %vm192_vm1, %v503_v25  ;;  %v672_v28 = vsel %vm670_vm5, %v667_v27, %v669_v26  ;;  %1831 = vmatprep.mubr.msk.f32.mxu1 %vm1914_vm0, %v1913_v0 }
  0x98   : > { %v660_v29 = vpop.permute.xlu1 %659  ;;  %1764 = vmatprep.subr.msk.mxu0 %vm192_vm1, %v672_v28  ;;  %577 = vmatprep.mubr.f32.mxu0 %v1913_v0 }
  0x99   : > { %1832 = vmatmul.mubr.msk.f32.vlgmr.msra.gmra.mrb[6].mxu1 %vm189_vm3, %v660_v29  ;;  %1834 = vmatprep.subr.mxu1 %v1913_v0 }
  0x9a   : > { %v665_v30 = vpop.permute.xlu0 %664  ;;  %1836 = vmatprep.mubr.msk.f32.mxu1 %vm1914_vm0, %v1913_v0 }
  0x9b   : > { %v671_v31 = vsel %vm670_vm5, %v665_v30, %v667_v27 }
  0x9c   : > { %v837_v32 = vpop.permute.xlu1 %836 }
  0x9d   : > { %1835 = vmatpush3.msk.msra.mxu1 %vm192_vm1, %v837_v32 }
  0x9e   : > { %1761 = vmatmul.mubr.msk.f32.vlgmr.msra.gmra.mrb[0].mxu0 %vm189_vm3, %v492_v23  ;;  %v835_v33 = vpop.permute.xlu0 %834  ;;  %1839 = vmatprep.subr.mxu1 %v1913_v0 }
  0x9f   : > { %1765 = vmatpush1.msk.msra.mxu0 %vm192_vm1, %v671_v31  ;;  %v840_v34 = vsel %vm838_vm6, %v835_v33, %v837_v32  ;;  %745 = vmatprep.mubr.f32.mxu0 %v1913_v0 }
  0xa0   : > { %v828_v35 = vpop.permute.xlu1 %827  ;;  %1769 = vmatprep.subr.msk.mxu0 %vm192_vm1, %v840_v34 }
  0xa1   : > { %1837 = vmatmul.mubr.msk.f32.vlgmr.msra.gmra.mrb[8].mxu1 %vm189_vm3, %v828_v35 }
  0xa2   : > { %v833_v36 = vpop.permute.xlu0 %832  ;;  %1841 = vmatprep.mubr.msk.f32.mxu1 %vm1914_vm0, %v1913_v0 }
  0xa3   : > { %v839_v37 = vsel %vm838_vm6, %v833_v36, %v835_v33 }
  0xa4   : > { %v1005_v38 = vpop.permute.xlu1 %1004 }
  0xa5   : > { %1840 = vmatpush3.msk.msra.mxu1 %vm192_vm1, %v1005_v38 }
  0xa6   : > { %1766 = vmatmul.mubr.msk.f32.vlgmr.msra.gmra.mrb[0].mxu0 %vm189_vm3, %v660_v29  ;;  %v1003_v39 = vpop.permute.xlu0 %1002  ;;  %1844 = vmatprep.subr.mxu1 %v1913_v0 }
  0xa7   : > { %1770 = vmatpush1.msk.msra.mxu0 %vm192_vm1, %v839_v37  ;;  %v1008_v40 = vsel %vm1006_vm7, %v1003_v39, %v1005_v38  ;;  %913 = vmatprep.mubr.f32.mxu0 %v1913_v0 }
  0xa8   : > { %v996_v41 = vpop.permute.xlu1 %995  ;;  %1774 = vmatprep.subr.msk.mxu0 %vm192_vm1, %v1008_v40 }
  0xa9   : > { %1842 = vmatmul.mubr.msk.f32.vlgmr.msra.gmra.mrb[10].mxu1 %vm189_vm3, %v996_v41 }
  0xaa   : > { %v1001_v42 = vpop.permute.xlu0 %1000  ;;  %1846 = vmatprep.mubr.msk.f32.mxu1 %vm1914_vm0, %v1913_v0 }
  0xab   : > { %v1007_v43 = vsel %vm1006_vm7, %v1001_v42, %v1003_v39 }
  0xac   : > { %v1173_v44 = vpop.permute.xlu1 %1172 }
  0xad   : > { %1845 = vmatpush3.msk.msra.mxu1 %vm192_vm1, %v1173_v44 }
  0xae   : > { %1771 = vmatmul.mubr.msk.f32.vlgmr.msra.gmra.mrb[0].mxu0 %vm189_vm3, %v828_v35  ;;  %v1171_v45 = vpop.permute.xlu0 %1170  ;;  %1849 = vmatprep.subr.mxu1 %v1913_v0 }
  0xaf   : > { %1775 = vmatpush1.msk.msra.mxu0 %vm192_vm1, %v1007_v43  ;;  %v1176_v46 = vsel %vm1174_vm8, %v1171_v45, %v1173_v44  ;;  %1081 = vmatprep.mubr.f32.mxu0 %v1913_v0 }
  0xb0   : > { %v1164_v47 = vpop.permute.xlu1 %1163  ;;  %1779 = vmatprep.subr.msk.mxu0 %vm192_vm1, %v1176_v46 }
  0xb1   : > { %1847 = vmatmul.mubr.msk.f32.vlgmr.msra.gmra.mrb[12].mxu1 %vm189_vm3, %v1164_v47 }
  0xb2   : > { %v1169_v48 = vpop.permute.xlu0 %1168  ;;  %1851 = vmatprep.mubr.msk.f32.mxu1 %vm1914_vm0, %v1913_v0 }
  0xb3   : > { %v1175_v49 = vsel %vm1174_vm8, %v1169_v48, %v1171_v45 }
  0xb4   : > { %v1341_v50 = vpop.permute.xlu1 %1340 }
  0xb5   : > { %1850 = vmatpush3.msk.msra.mxu1 %vm192_vm1, %v1341_v50 }
  0xb6   : > { %1776 = vmatmul.mubr.msk.f32.vlgmr.msra.gmra.mrb[0].mxu0 %vm189_vm3, %v996_v41  ;;  %v1339_v51 = vpop.permute.xlu0 %1338  ;;  %1854 = vmatprep.subr.mxu1 %v1913_v0 }
  0xb7   : > { %1780 = vmatpush1.msk.msra.mxu0 %vm192_vm1, %v1175_v49  ;;  %v1344_v52 = vsel %vm1342_vm9, %v1339_v51, %v1341_v50  ;;  %1249 = vmatprep.mubr.f32.mxu0 %v1913_v0 }
  0xb8   : > { %v1332_v53 = vpop.permute.xlu1 %1331  ;;  %1784 = vmatprep.subr.msk.mxu0 %vm192_vm1, %v1344_v52 }
  0xb9   : > { %1852 = vmatmul.mubr.msk.f32.vlgmr.msra.gmra.mrb[14].mxu1 %vm189_vm3, %v1332_v53 }
  0xba   : > { %v1337_v54 = vpop.permute.xlu0 %1336  ;;  %1856 = vmatprep.mubr.msk.f32.mxu1 %vm1914_vm0, %v1913_v0 }
  0xbb   : > { %v1343_v55 = vsel %vm1342_vm9, %v1337_v54, %v1339_v51 }
  0xbc   : > { %v1509_v56 = vpop.permute.xlu1 %1508 }
  0xbd   : > { %1855 = vmatpush3.msk.msra.mxu1 %vm192_vm1, %v1509_v56 }
  0xbe   : > { %1781 = vmatmul.mubr.msk.f32.vlgmr.msra.gmra.mrb[0].mxu0 %vm189_vm3, %v1164_v47  ;;  %v1507_v57 = vpop.permute.xlu0 %1506 }
  0xbf   : > { %1785 = vmatpush1.msk.msra.mxu0 %vm192_vm1, %v1343_v55  ;;  %v1512_v58 = vsel %vm1510_vm10, %v1507_v57, %v1509_v56  ;;  %1417 = vmatprep.mubr.f32.mxu0 %v1913_v0 }
  0xc0   : > { %v1500_v59 = vpop.permute.xlu1 %1499  ;;  %1789 = vmatprep.subr.msk.mxu0 %vm192_vm1, %v1512_v58 }
  0xc1   : > { %1857 = vmatmul.mubr.msk.f32.vlgmr.msra.gmra.mrb[16].mxu1 %vm189_vm3, %v1500_v59 }
  0xc2   : > { %v1505_v60 = vpop.permute.xlu0 %1504 }
  0xc3   : > { %v1511_v61 = vsel %vm1510_vm10, %v1505_v60, %v1507_v57 }
  0xc6   : > { %1786 = vmatmul.mubr.msk.f32.vlgmr.msra.gmra.mrb[0].mxu0 %vm189_vm3, %v1332_v53 }
  0xc7   : > { %1790 = vmatpush1.msk.msra.mxu0 %vm192_vm1, %v1511_v61  ;;  %1585 = vmatprep.mubr.f32.mxu0 %v1913_v0 }
  0xce   : > { %1791 = vmatmul.mubr.msk.f32.vlgmr.msra.gmra.mrb[0].mxu0 %vm189_vm3, %v1500_v59 }
  0xd3   : > { %v1669_v22 = vpop.permute.xlu0 %1668 }
 0x15f   : > { %v336_v62 = vpop.f32.mrb[0].mxu1 }
 0x160   : > { %v1818_v63 = vpop.f32.mrb[1].mxu1 }
 0x164   : > { %v485_v1 = vpop.f32.mrb[2].mxu1 }
 0x165   : > { %v486_v2 = vadd.f32 %v485_v1, %v336_v62  ;;  %v1823_v3 = vpop.f32.mrb[3].mxu1 }
 0x168   : > { %v650_v4 = vpop.f32.mrb[4].mxu1 }
 0x169   : > { %v656_v5 = vadd.f32 %v650_v4, %v486_v2  ;;  %v1828_v6 = vpop.f32.mrb[5].mxu1 }
 0x16c   : > { %v818_v7 = vpop.f32.mrb[6].mxu1 }
 0x16d   : > { %v824_v8 = vadd.f32 %v818_v7, %v656_v5  ;;  %v1833_v9 = vpop.f32.mrb[7].mxu1 }
 0x174   : > { %v986_v10 = vpop.f32.mrb[8].mxu1 }
 0x175   : > { %v992_v11 = vadd.f32 %v986_v10, %v824_v8  ;;  %v1838_v12 = vpop.f32.mrb[9].mxu1 }
 0x17c   : > { %v1154_v13 = vpop.f32.mrb[10].mxu1 }
 0x17d   : > { %v1160_v14 = vadd.f32 %v1154_v13, %v992_v11  ;;  %v1843_v0 = vpop.f32.mrb[11].mxu1 }
 0x184   : > { %v1322_v15 = vpop.f32.mrb[12].mxu1 }
 0x185   : > { %v1328_v16 = vadd.f32 %v1322_v15, %v1160_v14  ;;  %v1848_v17 = vpop.f32.mrb[13].mxu1 }
 0x18c   : > { %v1490_v18 = vpop.f32.mrb[14].mxu1 }
 0x18d   : > { %v1496_v19 = vadd.f32 %v1490_v18, %v1328_v16  ;;  %v1853_v20 = vpop.f32.mrb[15].mxu1 }
 0x194   : > { %v1658_v21 = vpop.f32.mrb[16].mxu1 }
 0x195   : > { %v1664_v23 = vadd.f32 %v1658_v21, %v1496_v19  ;;  %v1858_v24 = vpop.f32.mrb[17].mxu1 }
 0x197   : > { %v1673_v25 = vadd.f32 %v1669_v22, %v1664_v23 }
 0x199   : > { %vm1676_vm11 = vcmp.ge.f32.partialorder %v1673_v25, 0.0  ;;  %v1679_v26 = vmul.f32 0.1, %v1673_v25 }
 0x19b   : > { %v1682_v27 = vsel %vm1676_vm11, %v1673_v25, %v1679_v26 }
 0x19c   : > { %1686 = vst.msk [vmem:[%s170_s15 + $0x10] sm:$0xff] %vm1685_vm12, %v1682_v27 }
 0x1a1   : > { %v1587_v28 = vpop.f32.mrb[0].mxu0 }
 0x1a2   : > { %v1671_v29 = vadd.f32 %v1669_v22, %v1587_v28  ;;  %v1589_v30 = vpop.f32.mrb[1].mxu0 }
 0x1a3   : > { %v1672_v31 = vadd.f32 %v1669_v22, %v1589_v30 }
 0x1a4   : > { %vm1674_vm13 = vcmp.ge.f32.partialorder %v1671_v29, 0.0  ;;  %v1677_v32 = vmul.f32 0.1, %v1671_v29 }
 0x1a5   : > { %vm1675_vm14 = vcmp.ge.f32.partialorder %v1672_v31, 0.0  ;;  %v1678_v33 = vmul.f32 0.1, %v1672_v31 }
 0x1a6   : > { %v1680_v34 = vsel %vm1674_vm13, %v1671_v29, %v1677_v32 }
 0x1a7   : > { %1683 = vst [vmem:[%s170_s15] sm:$0xff] %v1680_v34  ;;  %v1681_v35 = vsel %vm1675_vm14, %v1672_v31, %v1678_v33 }
 0x1a8   : > { %1684 = vst [vmem:[%s170_s15 + $0x8] sm:$0xff] %v1681_v35 }
 0x1a9 PF: > { %s13_s12 = sadd.s32 1, %s1911_s12  }
 0x1aa   : > { %p10_p4 = scmp.ge.s32.totalorder %s13_s12, 4  }
 0x1ac   :  { %12 = sbr.rel (!%p10_p4) target bundleno = 1 (0x1), region = 62 }

</bundles_post_ra>
